<compile_context>
chip_gen: v5e
topology: v5e:2x2
jax: 0.10.0
libtpu: 0.0.40
codegen_flags: <defaults>
</compile_context>

<pallas_src>
import functools

import jax
import jax.numpy as jnp
import numpy as np
from jax.experimental import pallas as pl
from jax.experimental.pallas import tpu as pltpu


# ----------------------------- Pallas kernel -------------------------------
def _deepfm_kernel(rows_ref, w1_ref, w2_ref, summat_ref, const_ref, out_ref):
    # Products live on the LANE axis; features/hidden units on sublanes.
    E, FE = summat_ref.shape          # embedding_size, field_size * embedding_size
    F = FE // E
    H1 = w1_ref.shape[0]
    H2 = w2_ref.shape[0]

    semb = rows_ref[0:FE, :]          # (F*E, TP) second-order embeddings (transposed)
    femb = rows_ref[FE:FE + F, :]     # (F,   TP) first-order embeddings (transposed)

    c = const_ref[...]                # (R, 8) packed column constants (one DMA, resident)
    xv_col  = c[0:F,  0:1]            # Xv per field
    xvr_col = c[0:FE, 1:2]            # Xv repeated embedding_size times per field
    b1_col  = c[0:H1, 2:3]            # linear_1 bias + folded seq_emb @ W1_seq
    b2_col  = c[0:H2, 3:4]            # linear_2 bias
    wp1_col = c[0:F,  4:5]            # concat_projection weights (first-order slice)
    wp2_col = c[0:E,  5:6]            # concat_projection weights (second-order slice)
    wp3_col = c[0:H2, 6:7]            # concat_projection weights (deep slice)
    bp      = c[0:1,  7:8]            # concat_projection bias

    fm_first = femb * xv_col                              # (F,   TP)
    scaled   = semb * xvr_col                             # (F*E, TP) == deep_emb^T

    # FM second order: per-field sums via a 0/1 summation matrix -> one MXU pass
    # each instead of F tiny per-field dots.
    s  = jnp.dot(summat_ref[...], scaled,
                 preferred_element_type=jnp.float32)                      # (E, TP)
    sq = jnp.dot(summat_ref[...], scaled * scaled,
                 preferred_element_type=jnp.float32)                      # (E, TP)
    fm_second = 0.5 * (s * s - sq)

    # Deep MLP (dropout = identity in eval), one fused matmul per layer.
    x1 = jnp.maximum(
        jnp.dot(w1_ref[...], scaled, preferred_element_type=jnp.float32) + b1_col, 0.0)
    x2 = jnp.maximum(
        jnp.dot(w2_ref[...], x1, preferred_element_type=jnp.float32) + b2_col, 0.0)

    # concat_projection: VPU mul + sublane reductions (no N=1 matmuls, no concat).
    logits = (jnp.sum(fm_first * wp1_col, axis=0, keepdims=True)
              + jnp.sum(fm_second * wp2_col, axis=0, keepdims=True)
              + jnp.sum(x2 * wp3_col, axis=0, keepdims=True)
              + bp)                                                       # (1, TP)
    out_ref[...] = jax.nn.sigmoid(logits)


# ------------------------------ JAX wrapper ---------------------------------
def _pad_col(v, rows):
    v = jnp.asarray(v, jnp.float32).reshape(-1)
    return jnp.pad(v, (0, rows - v.shape[0]))


@functools.partial(jax.jit, static_argnames=("tile_p",))
def deepfm_forward(Xi, Xp, Xv, X_seq, params, *, tile_p=256):
    first_tables = params["first_tables"]      # (F, V, 1)
    second_tables = params["second_tables"]    # (F, V, E)
    seq_table = params["seq_table"]            # (C, S)
    w1, b1 = params["w1"], params["b1"]        # (F*E + S, H1), (1, H1)
    w2, b2 = params["w2"], params["b2"]        # (H1, H2), (1, H2)
    wp, bp = params["wp"], params["bp"]        # (F + E + H2, 1), (1, 1)

    P = Xp.shape[0]
    F, _, E = second_tables.shape
    FE = F * E
    H1 = w1.shape[1]
    H2 = w2.shape[1]
    assert P % tile_p == 0, "demo assumes product count divisible by the tile"

    # ---- module's index/value tiling + per-field embedding gathers (JAX glue) ----
    Xi_full = jnp.concatenate([jnp.tile(Xi[None, :], (P, 1)), Xp], axis=1)          # (P, F)
    femb = jnp.stack([first_tables[f][Xi_full[:, f], 0] for f in range(F)], axis=1)  # (P, F)
    semb = jnp.stack([second_tables[f][Xi_full[:, f]] for f in range(F)], axis=1)    # (P, F, E)

    # One per-tile slab, transposed so products map to lanes.
    rows_t = jnp.concatenate([semb.reshape(P, FE).T, femb.T], axis=0)               # (FE+F, P)

    # AVGModel sequence pooling is product-independent -> fold into linear_1 bias.
    seq_mean = seq_table[X_seq].mean(axis=0)                                        # (S,)
    b1_eff = b1[0] + seq_mean @ w1[FE:]                                             # (H1,)

    w1_t = w1[:FE].T                                                                # (H1, F*E)
    w2_t = w2.T                                                                     # (H2, H1)
    summat = jnp.tile(jnp.eye(E, dtype=jnp.float32), (1, F))                        # (E, F*E)

    crows = max(H1, H2, FE, 8)
    crows = -(-crows // 8) * 8
    xv = Xv.astype(jnp.float32)
    const_slab = jnp.stack([
        _pad_col(xv, crows),                      # col 0: Xv
        _pad_col(jnp.repeat(xv, E), crows),       # col 1: Xv repeated per embedding dim
        _pad_col(b1_eff, crows),                  # col 2: b1 + seq contribution
        _pad_col(b2[0], crows),                   # col 3: b2
        _pad_col(wp[:F, 0], crows),               # col 4: Wp first-order slice
        _pad_col(wp[F:F + E, 0], crows),          # col 5: Wp second-order slice
        _pad_col(wp[F + E:, 0], crows),           # col 6: Wp deep slice
        _pad_col(bp[0], crows),                   # col 7: bp
    ], axis=1)                                                                      # (crows, 8)

    grid = (P // tile_p,)
    out = pl.pallas_call(
        _deepfm_kernel,
        out_shape=jax.ShapeDtypeStruct((1, P), jnp.float32),
        grid_spec=pltpu.PrefetchScalarGridSpec(
            num_scalar_prefetch=0,
            grid=grid,
            in_specs=[
                pl.BlockSpec((FE + F, tile_p), lambda i: (0, i)),   # per-tile product rows
                pl.BlockSpec((H1, FE), lambda i: (0, 0)),           # resident weights
                pl.BlockSpec((H2, H1), lambda i: (0, 0)),
                pl.BlockSpec((E, FE), lambda i: (0, 0)),
                pl.BlockSpec((crows, 8), lambda i: (0, 0)),
            ],
            out_specs=pl.BlockSpec((1, tile_p), lambda i: (0, i)),  # lane-dense output slab
        ),
        compiler_params=pltpu.CompilerParams(dimension_semantics=("parallel",)),
    )(rows_t, w1_t, w2_t, summat, const_slab)
    return out.reshape(P, 1)


# ------------------------------ JAX reference --------------------------------
def deepfm_reference(Xi, Xp, Xv, X_seq, params):
    first_tables = params["first_tables"]
    second_tables = params["second_tables"]
    seq_table = params["seq_table"]
    w1, b1, w2, b2, wp, bp = (params["w1"], params["b1"], params["w2"],
                              params["b2"], params["wp"], params["bp"])
    P = Xp.shape[0]
    F, _, E = second_tables.shape
    Xi_full = jnp.concatenate([jnp.tile(Xi[None, :], (P, 1)), Xp], axis=1)
    Xv_full = jnp.tile(Xv[None, :], (P, 1)).astype(jnp.float32)
    femb = jnp.stack([first_tables[f][Xi_full[:, f], 0] for f in range(F)], axis=1)
    semb = jnp.stack([second_tables[f][Xi_full[:, f]] for f in range(F)], axis=1)
    fm_first = femb * Xv_full
    scaled = semb * Xv_full[:, :, None]
    s = scaled.sum(axis=1)
    sq = (scaled * scaled).sum(axis=1)
    fm_second = 0.5 * (s * s - sq)
    seq_emb = jnp.tile(seq_table[X_seq].mean(axis=0, keepdims=True), (P, 1))
    deep_in = jnp.concatenate([scaled.reshape(P, F * E), seq_emb], axis=1)
    x1 = jax.nn.relu(deep_in @ w1 + b1)
    x2 = jax.nn.relu(x1 @ w2 + b2)
    concat = jnp.concatenate([fm_first, fm_second, x2], axis=1)
    return jax.nn.sigmoid(concat @ wp + bp)


# --------------------------------- main --------------------------------------
if __name__ == "__main__":
    # Small model dims (consistent with the module defaults), batched product axis.
    P = 1024                    # product_num (batched to give the grid real work)
    TILE_P = 256                # products per grid step
    K_USER, K_PROD = 3, 1
    F = K_USER + K_PROD         # field_size
    E = 4                       # embedding_size
    VOCAB = 16                  # per-field feature_size
    CHANNEL = 64                # seq vocab (synthetic, small)
    S = 64                      # seq_emb_size
    L = 8                       # sequence length
    H1, H2 = 32, 32             # deep_layers

    key = jax.random.PRNGKey(0)
    ks = jax.random.split(key, 14)

    params = dict(
        first_tables=jax.random.normal(ks[0], (F, VOCAB, 1), jnp.float32) * 0.1,
        second_tables=jax.random.normal(ks[1], (F, VOCAB, E), jnp.float32) * 0.1,
        seq_table=jax.random.normal(ks[2], (CHANNEL, S), jnp.float32) * 0.1,
        w1=jax.random.normal(ks[3], (F * E + S, H1), jnp.float32) * 0.1,
        b1=jax.random.normal(ks[4], (1, H1), jnp.float32) * 0.1,
        w2=jax.random.normal(ks[5], (H1, H2), jnp.float32) * 0.1,
        b2=jax.random.normal(ks[6], (1, H2), jnp.float32) * 0.1,
        wp=jax.random.normal(ks[7], (F + E + H2, 1), jnp.float32) * 0.1,
        bp=jax.random.normal(ks[8], (1, 1), jnp.float32) * 0.1,
    )

    Xi = jax.random.randint(ks[9], (K_USER,), 0, VOCAB, jnp.int32)        # user indices
    Xp = jax.random.randint(ks[10], (P, K_PROD), 0, VOCAB, jnp.int32)     # product indices
    Xv = jax.random.uniform(ks[11], (F,), jnp.float32, 0.5, 1.5)          # field values
    X_seq = jax.random.randint(ks[12], (L,), 0, CHANNEL, jnp.int32)       # sequence

    out = jax.block_until_ready(deepfm_forward(Xi, Xp, Xv, X_seq, params, tile_p=TILE_P))
    ref = jax.block_until_ready(deepfm_reference(Xi, Xp, Xv, X_seq, params))

    assert out.shape == (P, 1)
    np.testing.assert_allclose(np.asarray(out), np.asarray(ref), rtol=1e-3, atol=1e-4)
    print("KERNEL_OK")
</pallas_src>

<mosaic_0001>
module attributes {stable_mosaic.version = 11 : i64} {
  func.func @_deepfm_kernel(%arg0: i32, %arg1: memref<20x256xf32, #tpu.memory_space<vmem>>, %arg2: memref<32x16xf32, #tpu.memory_space<vmem>>, %arg3: memref<32x32xf32, #tpu.memory_space<vmem>>, %arg4: memref<4x16xf32, #tpu.memory_space<vmem>>, %arg5: memref<32x8xf32, #tpu.memory_space<vmem>>, %arg6: memref<1x256xf32, #tpu.memory_space<vmem>>) attributes {dimension_semantics = [#tpu.dimension_semantics<parallel>], iteration_bounds = array<i64: 4>, scalar_prefetch = 0 : i64, scratch_operands = 0 : i64, tpu.core_type = #tpu.core_type<tc>, window_params = [{transform_indices = @transform_0, window_bounds = array<i64: 20, 256>}, {pipeline_mode = #tpu.pipeline_mode<synchronous>, transform_indices = @transform_1, window_bounds = array<i64: 32, 16>}, {pipeline_mode = #tpu.pipeline_mode<synchronous>, transform_indices = @transform_2, window_bounds = array<i64: 32, 32>}, {pipeline_mode = #tpu.pipeline_mode<synchronous>, transform_indices = @transform_3, window_bounds = array<i64: 4, 16>}, {pipeline_mode = #tpu.pipeline_mode<synchronous>, transform_indices = @transform_4, window_bounds = array<i64: 32, 8>}, {transform_indices = @transform_5, window_bounds = array<i64: 1, 256>}]} {
    %c0 = arith.constant 0 : index
    %c0_0 = arith.constant 0 : index
    %0 = vector.load %arg1[%c0, %c0_0] : memref<20x256xf32, #tpu.memory_space<vmem>>, vector<16x256xf32>
    %c16 = arith.constant 16 : index
    %c0_1 = arith.constant 0 : index
    %1 = vector.load %arg1[%c16, %c0_1] : memref<20x256xf32, #tpu.memory_space<vmem>>, vector<4x256xf32>
    %c0_2 = arith.constant 0 : index
    %c0_3 = arith.constant 0 : index
    %2 = vector.load %arg5[%c0_2, %c0_3] : memref<32x8xf32, #tpu.memory_space<vmem>>, vector<32x8xf32>
    %3 = vector.extract_strided_slice %2 {offsets = [0, 0], sizes = [4, 1], strides = [1, 1]} : vector<32x8xf32> to vector<4x1xf32>
    %4 = vector.extract_strided_slice %2 {offsets = [0, 1], sizes = [16, 1], strides = [1, 1]} : vector<32x8xf32> to vector<16x1xf32>
    %5 = vector.extract_strided_slice %2 {offsets = [0, 2], sizes = [32, 1], strides = [1, 1]} : vector<32x8xf32> to vector<32x1xf32>
    %6 = vector.extract_strided_slice %2 {offsets = [0, 3], sizes = [32, 1], strides = [1, 1]} : vector<32x8xf32> to vector<32x1xf32>
    %7 = vector.extract_strided_slice %2 {offsets = [0, 4], sizes = [4, 1], strides = [1, 1]} : vector<32x8xf32> to vector<4x1xf32>
    %8 = vector.extract_strided_slice %2 {offsets = [0, 5], sizes = [4, 1], strides = [1, 1]} : vector<32x8xf32> to vector<4x1xf32>
    %9 = vector.extract_strided_slice %2 {offsets = [0, 6], sizes = [32, 1], strides = [1, 1]} : vector<32x8xf32> to vector<32x1xf32>
    %10 = vector.extract_strided_slice %2 {offsets = [0, 7], sizes = [1, 1], strides = [1, 1]} : vector<32x8xf32> to vector<1x1xf32>
    %11 = vector.broadcast %3 : vector<4x1xf32> to vector<4x256xf32>
    %12 = arith.mulf %1, %11 : vector<4x256xf32>
    %13 = vector.broadcast %4 : vector<16x1xf32> to vector<16x256xf32>
    %14 = arith.mulf %0, %13 : vector<16x256xf32>
    %c0_4 = arith.constant 0 : index
    %c0_5 = arith.constant 0 : index
    %15 = vector.load %arg4[%c0_4, %c0_5] : memref<4x16xf32, #tpu.memory_space<vmem>>, vector<4x16xf32>
    %cst = arith.constant dense<0.000000e+00> : vector<4x256xf32>
    %16 = tpu.matmul %15, %14, %cst {dimension_numbers = #tpu.dot_dimension_numbers<[1], [0], [0], [1], [0, 0, 1, 1], [], []>} : vector<4x16xf32>, vector<16x256xf32>, vector<4x256xf32> -> vector<4x256xf32>
    %c0_6 = arith.constant 0 : index
    %c0_7 = arith.constant 0 : index
    %17 = vector.load %arg4[%c0_6, %c0_7] : memref<4x16xf32, #tpu.memory_space<vmem>>, vector<4x16xf32>
    %18 = arith.mulf %14, %14 : vector<16x256xf32>
    %cst_8 = arith.constant dense<0.000000e+00> : vector<4x256xf32>
    %19 = tpu.matmul %17, %18, %cst_8 {dimension_numbers = #tpu.dot_dimension_numbers<[1], [0], [0], [1], [0, 0, 1, 1], [], []>} : vector<4x16xf32>, vector<16x256xf32>, vector<4x256xf32> -> vector<4x256xf32>
    %20 = arith.mulf %16, %16 : vector<4x256xf32>
    %21 = arith.subf %20, %19 : vector<4x256xf32>
    %cst_9 = arith.constant 5.000000e-01 : f32
    %22 = vector.broadcast %cst_9 : f32 to vector<4x256xf32>
    %23 = arith.mulf %22, %21 : vector<4x256xf32>
    %c0_10 = arith.constant 0 : index
    %c0_11 = arith.constant 0 : index
    %24 = vector.load %arg2[%c0_10, %c0_11] : memref<32x16xf32, #tpu.memory_space<vmem>>, vector<32x16xf32>
    %cst_12 = arith.constant dense<0.000000e+00> : vector<32x256xf32>
    %25 = tpu.matmul %24, %14, %cst_12 {dimension_numbers = #tpu.dot_dimension_numbers<[1], [0], [0], [1], [0, 0, 1, 1], [], []>} : vector<32x16xf32>, vector<16x256xf32>, vector<32x256xf32> -> vector<32x256xf32>
    %26 = vector.broadcast %5 : vector<32x1xf32> to vector<32x256xf32>
    %27 = arith.addf %25, %26 : vector<32x256xf32>
    %cst_13 = arith.constant 0.000000e+00 : f32
    %28 = vector.broadcast %cst_13 : f32 to vector<32x256xf32>
    %29 = arith.maximumf %27, %28 : vector<32x256xf32>
    %c0_14 = arith.constant 0 : index
    %c0_15 = arith.constant 0 : index
    %30 = vector.load %arg3[%c0_14, %c0_15] : memref<32x32xf32, #tpu.memory_space<vmem>>, vector<32x32xf32>
    %cst_16 = arith.constant dense<0.000000e+00> : vector<32x256xf32>
    %31 = tpu.matmul %30, %29, %cst_16 {dimension_numbers = #tpu.dot_dimension_numbers<[1], [0], [0], [1], [0, 0, 1, 1], [], []>} : vector<32x32xf32>, vector<32x256xf32>, vector<32x256xf32> -> vector<32x256xf32>
    %32 = vector.broadcast %6 : vector<32x1xf32> to vector<32x256xf32>
    %33 = arith.addf %31, %32 : vector<32x256xf32>
    %cst_17 = arith.constant 0.000000e+00 : f32
    %34 = vector.broadcast %cst_17 : f32 to vector<32x256xf32>
    %35 = arith.maximumf %33, %34 : vector<32x256xf32>
    %36 = vector.broadcast %7 : vector<4x1xf32> to vector<4x256xf32>
    %37 = arith.mulf %12, %36 : vector<4x256xf32>
    %cst_18 = arith.constant dense<0.000000e+00> : vector<256xf32>
    %38 = vector.multi_reduction <add>, %37, %cst_18 [0] : vector<4x256xf32> to vector<256xf32>
    %39 = vector.shape_cast %38 : vector<256xf32> to vector<1x256xf32>
    %40 = vector.broadcast %8 : vector<4x1xf32> to vector<4x256xf32>
    %41 = arith.mulf %23, %40 : vector<4x256xf32>
    %cst_19 = arith.constant dense<0.000000e+00> : vector<256xf32>
    %42 = vector.multi_reduction <add>, %41, %cst_19 [0] : vector<4x256xf32> to vector<256xf32>
    %43 = vector.shape_cast %42 : vector<256xf32> to vector<1x256xf32>
    %44 = arith.addf %39, %43 : vector<1x256xf32>
    %45 = vector.broadcast %9 : vector<32x1xf32> to vector<32x256xf32>
    %46 = arith.mulf %35, %45 : vector<32x256xf32>
    %cst_20 = arith.constant dense<0.000000e+00> : vector<256xf32>
    %47 = vector.multi_reduction <add>, %46, %cst_20 [0] : vector<32x256xf32> to vector<256xf32>
    %48 = vector.shape_cast %47 : vector<256xf32> to vector<1x256xf32>
    %49 = arith.addf %44, %48 : vector<1x256xf32>
    %50 = vector.broadcast %10 : vector<1x1xf32> to vector<1x256xf32>
    %51 = arith.addf %49, %50 : vector<1x256xf32>
    %52 = arith.negf %51 : vector<1x256xf32>
    %53 = math.exp %52 : vector<1x256xf32>
    %cst_21 = arith.constant 1.000000e+00 : f32
    %54 = vector.broadcast %cst_21 : f32 to vector<1x256xf32>
    %55 = arith.addf %54, %53 : vector<1x256xf32>
    %56 = arith.divf %54, %55 : vector<1x256xf32>
    %c0_22 = arith.constant 0 : index
    %c0_23 = arith.constant 0 : index
    %57 = vector.load %arg6[%c0_22, %c0_23] : memref<1x256xf32, #tpu.memory_space<vmem>>, vector<1x256xf32>
    tpu.vector_store %arg6[%c0_22, %c0_23], %56 {strides = array<i32>} : memref<1x256xf32, #tpu.memory_space<vmem>>, vector<1x256xf32>,
    return
  }
  func.func @transform_0(%arg0: i32) -> (i32, i32) {
    %c0_i32 = arith.constant 0 : i32
    %c0_i32_0 = arith.constant 0 : i32
    return %c0_i32, %arg0 : i32, i32
  }
  func.func @transform_1(%arg0: i32) -> (i32, i32) {
    %c0_i32 = arith.constant 0 : i32
    %c0_i32_0 = arith.constant 0 : i32
    %c0_i32_1 = arith.constant 0 : i32
    return %c0_i32, %c0_i32_0 : i32, i32
  }
  func.func @transform_2(%arg0: i32) -> (i32, i32) {
    %c0_i32 = arith.constant 0 : i32
    %c0_i32_0 = arith.constant 0 : i32
    %c0_i32_1 = arith.constant 0 : i32
    return %c0_i32, %c0_i32_0 : i32, i32
  }
  func.func @transform_3(%arg0: i32) -> (i32, i32) {
    %c0_i32 = arith.constant 0 : i32
    %c0_i32_0 = arith.constant 0 : i32
    %c0_i32_1 = arith.constant 0 : i32
    return %c0_i32, %c0_i32_0 : i32, i32
  }
  func.func @transform_4(%arg0: i32) -> (i32, i32) {
    %c0_i32 = arith.constant 0 : i32
    %c0_i32_0 = arith.constant 0 : i32
    %c0_i32_1 = arith.constant 0 : i32
    return %c0_i32, %c0_i32_0 : i32, i32
  }
  func.func @transform_5(%arg0: i32) -> (i32, i32) {
    %c0_i32 = arith.constant 0 : i32
    %c0_i32_0 = arith.constant 0 : i32
    return %c0_i32, %arg0 : i32, i32
  }
}

</mosaic_0001>

<bundles_post_ra>
// kernel: tile.17
= control target key start
LH: loop header
LB: loop body
LE: loop exit
PB: predicated region body
PF: predicated region fallthrough
CT: control target
= control target key end

     0   :  { %s52_s14 = smov 4   ;;  %s53_s15 = smov 8   ;;  %vm19_vm0 = vcmask 31744   ;;  %vm25_vm1 = vcmask 130144   ;;  %vm31_vm2 = vcmask 97344   ;;  %vm37_vm3 = vcmask 64544   ;;  %s79_s0 = inlined_call_operand.vmem [shape: f32[4,4,4], index: 0, kind: input, shape index: {}]   ;;  %s80_s1 = inlined_call_operand.vmem [shape: f32[4,16], index: 1, kind: output, shape index: {}]  }
   0x1   :  { %v45_v0 = vld [vmem:[%s79_s0 + $0xc] sm:$0xf]  ;;  %v46_v1 = vld [vmem:[%s79_s0 + $0x8] sm:$0xf]  ;;  %v47_v2 = vld [vmem:[%s79_s0 + $0x4] sm:$0xf] }
   0x2   :  { %7 = vst [vmem:[#allocation1 + $0x18] sm:$0xf] %v45_v0  ;;  %v16_v3 = vld [vmem:[%s79_s0] sm:$0xf]  ;;  %s51_s0 = smov 12  }
   0x3   :  { %11 = vst [vmem:[#allocation1 + $0x10] sm:$0xf] %v46_v1 }
   0x4   :  { %15 = vst [vmem:[#allocation1 + $0x8] sm:$0xf] %v47_v2 }
   0x5   :  { %17 = vst [vmem:[#allocation1] sm:$0xf] %v16_v3 }
   0xc   :  { %v22_v4 = vld [vmem:[#allocation1 + $0x3] ss:$8 sm:$0xf]   ;;  %v34_v5 = vld [vmem:[#allocation1 + $0x1] ss:$8 sm:$0xf]  }
   0xd   :  { %23 = vrot.lane.b32.xlu0 %v22_v4, %s51_s0  ;;  %35 = vrot.lane.b32.xlu1 %v34_v5, %s52_s14  ;;  %v28_v6 = vld [vmem:[#allocation1 + $0x2] ss:$8 sm:$0xf]   ;;  %v18_v7 = vld [vmem:[#allocation1] ss:$8 sm:$0xf]  }
   0xe   :  { %20 = vst.msk [vmem:[#allocation0] sm:$0xf] %vm19_vm0, %v18_v7  }
  0x15   :  { %29 = vrot.lane.b32.xlu0 %v28_v6, %s53_s15 }
  0x7f   :  { %v24_v8 = vpop.permute.xlu0 %23   ;;  %v36_v9 = vpop.permute.xlu1 %35  }
  0x80   :  { %26 = vst.msk [vmem:[#allocation0] sm:$0xf] %vm25_vm1, %v24_v8  }
  0x87   :  { %v30_v10 = vpop.permute.xlu0 %29  }
  0x88   :  { %32 = vst.msk [vmem:[#allocation0] sm:$0xf] %vm31_vm2, %v30_v10  }
  0x89   :  { %38 = vst.msk [vmem:[#allocation0] sm:$0xf] %vm37_vm3, %v36_v9  }
  0x90   :  { %v41_v11 = vld [vmem:[#allocation0] sm:$0xf] }
  0x91   :  { %44 = vst [vmem:[%s80_s1] sm:$0xf] %v41_v11 }

// kernel: deepfm_forward.1
= control target key start
LH: loop header
LB: loop body
LE: loop exit
PB: predicated region body
PF: predicated region fallthrough
CT: control target
= control target key end

     0   :  { %10 = vsyncpa [#allocation4], 0  ;;  %s1192_s0 = inlined_call_operand.vmem [shape: f32[20,1024], index: 0, kind: input, shape index: {}]   ;;  %s1193_s1 = inlined_call_operand.vmem [shape: f32[32,16], index: 1, kind: input, shape index: {}]   ;;  %s1194_s2 = inlined_call_operand.vmem [shape: f32[32,32], index: 2, kind: input, shape index: {}]   ;;  %s1195_s3 = inlined_call_operand.vmem [shape: f32[4,16], index: 3, kind: input, shape index: {}]   ;;  %s1196_s4 = inlined_call_operand.vmem [shape: f32[32,8], index: 4, kind: input, shape index: {}]   ;;  %s1197_s5 = inlined_call_operand.hbm [shape: f32[1,1024], index: 5, kind: output, shape index: {}]  }
   0x1   :  { %12 = vsyncpa [#allocation4 + $0x1], 0  ;;  %s1008_s18 = smov 0   ;;  %s1010_s19 = smov 0  }
   0x2   :  { %s1012_s20 = smov 0   ;;  %s1014_s21 = smov 0  }
   0x3 LB: > { %s801_s22 = sadd.s32 4294967295, %s968_s21   ;;  %s802_s23 = sadd.s32 4294967294, %s968_s21   ;;  %s968_s21 = sphi %s1014_s21, %s1205_s21   ;;  %s964_s20 = sphi %s1012_s20, %s1204_s20   ;;  %s960_s19 = sphi %s1010_s19, %s1203_s19   ;;  %s956_s18 = sphi %s1008_s18, %s1202_s18  }
   0x4   : > { %s1031_s24 = sadd.s32 1, %s968_s21   ;;  %s25_s25 = sadd.s32 1, %s964_s20 }
   0x5   : > { %s22_s26 = ssub.s32 %s968_s21, %s1031_s24  ;;  %p32_p0 = scmp.ne.s32.totalorder %s964_s20, %s960_s19 }
   0x6   : > { %p23_p1 = scmp.eq.s32.totalorder %s22_s26, 0  ;;  %p33_p2 = scmp.eq.s32.totalorder %s968_s21, 0 }
   0x7   : > { %p146_p3 = scmp.eq.s32.totalorder %s801_s22, 3  ;;  %p151_p4 = scmp.ne.s32.totalorder %s960_s19, %s956_s18 }
   0x8   : > { %s1044_s27 = scalar_select %p23_p1, %s964_s20, %s25_s25  }
   0x9   : > { %p34_p5 = por %p33_p2, %p32_p0  ;;  %p1046_p6 = por %p146_p3, %p32_p0 }
   0xa   : > { %p152_p7 = scmp.eq.s32.totalorder %s802_s23, 3  ;;  %p804_p9 = scmp.ge.s32.totalorder %s968_s21, 4 }
   0xc   : > { %p1050_p8 = por %p152_p7, %p151_p4  ;;  %180 = sbr.rel (%p804_p9) target bundleno = 27 (0x1b), region = 32 }
  0x11   : > { %183 = sbr.rel (!%p34_p5) target bundleno = 27 (0x1b), region = 36  ;;  %s185_s30 = sand.u32 (%p34_p5), 1, %s964_s20  }
  0x12   : > { %s835_s6 = sshll.u32 (%p34_p5), %s968_s21, 4  ;;  %s836_s7 = smul.u32 (%p34_p5), 48, %s185_s30 }
  0x13   : > { %s190_s10 = scalar_lea.vmem (%p34_p5), %s1192_s0, %s835_s6 }
  0x14   : > { %v203_v0 = vld [vmem:[%s190_s10] sm:$0xff] (%p34_p5)  ;;  %v205_v1 = vld [vmem:[%s190_s10 + $0x8] sm:$0xff] (%p34_p5)  ;;  %s187_s11 = scalar_lea.vmem (%p34_p5), [#allocation2], %s836_s7 }
  0x15   : > { %v207_v2 = vld [vmem:[%s190_s10 + $0x40] sm:$0xff] (%p34_p5)  ;;  %204 = vst [vmem:[%s187_s11] sm:$0xff] (%p34_p5), %v203_v0  ;;  %v209_v3 = vld [vmem:[%s190_s10 + $0x48] sm:$0xff] (%p34_p5) }
  0x16   : > { %206 = vst [vmem:[%s187_s11 + $0x8] sm:$0xff] %v205_v1  ;;  %v211_v4 = vld [vmem:[%s190_s10 + $0x80] sm:$0xff]  ;;  %v213_v5 = vld [vmem:[%s190_s10 + $0x88] sm:$0xff] }
  0x17   : > { %208 = vst [vmem:[%s187_s11 + $0x10] sm:$0xff] %v207_v2 }
  0x18   : > { %210 = vst [vmem:[%s187_s11 + $0x18] sm:$0xff] %v209_v3 }
  0x19   : > { %212 = vst [vmem:[%s187_s11 + $0x20] sm:$0xff] %v211_v4 }
  0x1a   : > { %214 = vst [vmem:[%s187_s11 + $0x28] sm:$0xff] %v213_v5 }
  0x1b PF: > { %p807_p10 = scmp.ge.s32.totalorder %s968_s21, 1  ;;  %p219_p11 = scmp.lt.s32.totalorder %s968_s21, 5 }
  0x1d   : > { %p220_p12 = pnand %p807_p10, %p219_p11 }
  0x1e   : > { %s1084_s26 = sand.u32 (!%p220_p12), 1, %s960_s19   ;;  %s832_s11 = sshll.u32 (!%p220_p12), %s801_s22, 1 }
  0x1f   : > { %223 = sbr.rel (%p220_p12) target bundleno = 548 (0x224), region = 59  ;;  %s732_s14 = scalar_lea.hbm (!%p220_p12), %s1197_s5, %s832_s11 }
  0x20   : > { %s837_s30 = smul.u32 (!%p220_p12), 48, %s1084_s26  ;;  %s736_s16 = sshll.u32 (!%p220_p12), %s732_s14, 4  ;;  %s737_s16 = int_to_ptr.hbm [resolvable:$true] %s736_s16 }
  0x21   : > { %s722_s17 = scalar_lea.sflag (!%p220_p12), [#allocation4], %s1084_s26  ;;  %s920_s23 = sshra.s32 (!%p220_p12), %s737_s16, 4  ;;  %s921_s23 = int_to_ptr.hbm [resolvable:$true] %s920_s23 }
  0x22   : > { %s1088_s6 = scalar_lea.vmem (!%p220_p12), [#allocation2], %s837_s30  ;;  %s922_s25 = scalar_lea.hbm (!%p220_p12), %s921_s23, 2 }
  0x23   : > { %p923_p13 = scmp.ne.s32.totalorder (!%p220_p12), %s921_s23, %s922_s25  ;;  %s926_s8 = scalar_lea.hbm (!%p220_p12), %s1197_s5, 8 }
  0x24   : > { %v262_v6 = vld [vmem:[%s1196_s4 + $0x8] sm:$0xff]  ;;  %v1068_v7 = vld [vmem:[%s1196_s4 + $0x18] sm:$0xff]  ;;  %v970_v8 = vmov 1   ;;  %v971_v9 = vmov 2   ;;  %v1074_v10 = vld [vmem:[%s1196_s4] sm:$0xff]  ;;  %v972_v12 = vmov 3   ;;  %p927_p2 = scmp.lt.s32.totalorder %s921_s23, %s1197_s5  ;;  %p928_p3 = scmp.lt.s32.totalorder %s926_s8, %s922_s25 }
  0x25   : > { %885 = vset.pattern.permute.xlu0 %v970_v8  ;;  %886 = vset.pattern.permute.xlu1 %v971_v9  ;;  %v263_v11 = vld [vmem:[%s1196_s4 + $0x10] sm:$0xff]  ;;  %v973_v13 = vmov 0   ;;  %v258_v15 = vld [vmem:[%s1088_s6 + $0x18] sm:$0xff]  ;;  %v974_v17 = vmov 4   ;;  %v256_v23 = vld [vmem:[%s1088_s6 + $0x8] sm:$0xff]  ;;  %v975_v24 = vmov 6   ;;  %p924_p0 = pnand %p923_p13, %p1046_p6 }
  0x26   : > { %278 = vperm.xlu0 %885, %v262_v6   ;;  %399 = vperm.xlu1 %886, %v1068_v7   ;;  %v257_v14 = vld [vmem:[%s1088_s6 + $0x10] sm:$0xff]  ;;  %v255_v22 = vld [vmem:[%s1088_s6] sm:$0xff]  ;;  %vm286_vm0 = vcmask 130048   ;;  %v381_v32 = vld [vmem:[%s1193_s1 + $0x8] sm:$0xff]  ;;  %v976_v33 = vmov 5   ;;  %v977_v62 = vmov 7   ;;  %p929_p4 = por %p928_p3, %p927_p2 }
  0x27   : > { %887 = vset.pattern.permute.xlu2 %v971_v9  ;;  %v285_v28 = vld [vmem:[%s1195_s3] sm:$0xf]  ;;  %v382_v34 = vld [vmem:[%s1193_s1 + $0x10] sm:$0xff]  ;;  %v383_v35 = vld [vmem:[%s1193_s1 + $0x18] sm:$0xff]  ;;  %vm500_vm1 = vcmask 261120   ;;  %vm585_vm2 = vcmask 1043456   ;;  %p925_p1 = pneg %p924_p0 }
  0x28   : > { %389 = vperm.xlu2 %887, %v262_v6   ;;  %v380_v31 = vld [vmem:[%s1193_s1] sm:$0xff]  ;;  %v481_v4 = vld [vmem:[%s1194_s2 + $0x8] sm:$0xff]  ;;  %v482_v5 = vld [vmem:[%s1194_s2 + $0x10] sm:$0xff]  ;;  %vm713_vm10 = vcmask 1040384  }
  0x29   : > { %v480_v3 = vld [vmem:[%s1194_s2] sm:$0xff]  ;;  %p930_p5 = pnand %p929_p4, %p925_p1 }
  0x2e   : > { %273 = vperm.xlu0 %885, %v1074_v10   ;;  %394 = vperm.xlu1 %886, %v263_v11  }
  0x30   : > { %385 = vperm.xlu2 %887, %v1074_v10  }
  0x36   : > { %889 = vset.pattern.permute.xlu1 %v972_v12  ;;  %888 = vset.pattern.permute.xlu0 %v972_v12 }
  0x37   : > { %489 = vperm.xlu1 %889, %v262_v6   ;;  %485 = vperm.xlu0 %888, %v1074_v10  }
  0x38   : > { %890 = vset.pattern.permute.xlu2 %v972_v12 }
  0x39   : > { %493 = vperm.xlu2 %890, %v263_v11  }
  0x3f   : > { %497 = vperm.xlu1 %889, %v1068_v7   ;;  %892 = vset.pattern.permute.xlu0 %v975_v24 }
  0x40   : > { %627 = vperm.xlu0 %892, %v262_v6   ;;  %v483_v6 = vld [vmem:[%s1194_s2 + $0x18] sm:$0xff] }
  0x41   : > { %891 = vset.pattern.permute.xlu2 %v975_v24 }
  0x42   : > { %623 = vperm.xlu2 %891, %v1074_v10  }
  0x47   : > { %893 = vset.pattern.permute.xlu1 %v973_v13 }
  0x48   : > { %267 = vperm.xlu1 %893, %v1074_v10   ;;  %635 = vperm.xlu0 %892, %v1068_v7  }
  0x4a   : > { %631 = vperm.xlu2 %891, %v263_v11  }
  0x50   : > { %894 = vset.pattern.permute.xlu1 %v974_v17  ;;  %897 = vset.pattern.permute.xlu0 %v977_v62 }
  0x51   : > { %580 = vperm.xlu1 %894, %v1074_v10  }
  0x52   : > { %895 = vset.pattern.permute.xlu2 %v976_v33 }
  0x53   : > { %601 = vperm.xlu2 %895, %v1074_v10  }
  0x59   : > { %896 = vset.pattern.permute.xlu1 %v977_v62 }
  0x5a   : > { %667 = vperm.xlu1 %896, %v1074_v10  }
  0x82   : > { %v390_v45 = vpop.permute.xlu2 %389 }
  0x8a   : > { %v386_v57 = vpop.permute.xlu2 %385 }
  0x93   : > { %v494_v8 = vpop.permute.xlu2 %493 }
  0x98   : > { %v279_v16 = vpop.permute.xlu0 %278  ;;  %v400_v42 = vpop.permute.xlu1 %399 }
  0x99   : > { %v283_v18 = vmul.f32 %v279_v16, %v257_v14  ;;  %v284_v19 = vmul.f32 %v279_v16, %v258_v15 }
  0x9b   : > { %304 = vmatpush.msra.mxu0 %v283_v18  ;;  %324 = vmatpush.msra.mxu1 %v284_v19  ;;  %v332_v20 = vmul.f32 %v283_v18, %v283_v18  ;;  %v333_v21 = vmul.f32 %v284_v19, %v284_v19 }
  0x9c   : > { %v624_v10 = vpop.permute.xlu2 %623 }
  0x9d   : > { %348 = vmatpush.msra.mxu2 %v332_v20  ;;  %368 = vmatpush.msra.mxu3 %v333_v21  ;;  %v260_v20 = vld [vmem:[%s1088_s6 + $0x28] sm:$0xf] }
  0xa0   : > { %v274_v25 = vpop.permute.xlu0 %273  ;;  %v395_v46 = vpop.permute.xlu1 %394 }
  0xa1   : > { %v281_v26 = vmul.f32 %v274_v25, %v255_v22  ;;  %v282_v27 = vmul.f32 %v274_v25, %v256_v23 }
  0xa3   : > { %305 = vmatpush.msra.mxu0 %v281_v26  ;;  %325 = vmatpush.msra.mxu1 %v282_v27  ;;  %v330_v29 = vmul.f32 %v281_v26, %v281_v26  ;;  %v331_v30 = vmul.f32 %v282_v27, %v282_v27 }
  0xa4   : > { %809 = vmatmul.msk.f32.vlgmr.msra.gmra.mxu0 %vm286_vm0, %v285_v28  ;;  %810 = vmatmul.msk.f32.vlgmr.msra.gmra.mxu1 %vm286_vm0, %v285_v28  ;;  %v632_v14 = vpop.permute.xlu2 %631 }
  0xa5   : > { %428 = vmatpush.msrb.mxu0 %v283_v18  ;;  %457 = vmatpush.msrb.mxu1 %v284_v19  ;;  %v259_v19 = vld [vmem:[%s1088_s6 + $0x20] sm:$0xf]  ;;  %s808_s6 = sshll.u32 %s1084_s26, 1 }
  0xa6   : > { %349 = vmatpush.msra.mxu2 %v330_v29  ;;  %369 = vmatpush.msra.mxu3 %v331_v30  ;;  %s252_s22 = scalar_lea.vmem [#allocation3], %s808_s6 }
  0xa7   : > { %811 = vmatmul.msk.f32.vlgmr.msra.gmra.mxu2 %vm286_vm0, %v285_v28  ;;  %812 = vmatmul.msk.f32.vlgmr.msra.gmra.mxu3 %vm286_vm0, %v285_v28  ;;  %s734_s15 = sshll.u32 %s252_s22, 4  ;;  %s735_s15 = int_to_ptr.vmem [resolvable:$true] %s734_s15 }
  0xa8   : > { %429 = vmatpush.msrb.mxu0 %v281_v26  ;;  %458 = vmatpush.msrb.mxu1 %v282_v27 }
  0xa9   : > { %v490_v7 = vpop.permute.xlu1 %489  ;;  %v486_v33 = vpop.permute.xlu0 %485 }
  0xac   : > { %813 = vmatmul.msk.f32.vlgmr.msrb.gmra.mxu0 %vm286_vm0, %v380_v31  ;;  %817 = vmatmul.msk.f32.vlgmr.msrb.gmra.mxu1 %vm286_vm0, %v380_v31 }
  0xad   : > { %v602_v28 = vpop.permute.xlu2 %601 }
  0xb1   : > { %v1142_v9 = vpop.permute.xlu1 %497 }
  0xb4   : > { %814 = vmatmul.msk.f32.gmra.mxu0 %vm286_vm0, %v381_v32  ;;  %818 = vmatmul.msk.f32.gmra.mxu1 %vm286_vm0, %v381_v32 }
  0xba   : > { %v268_v13 = vpop.permute.xlu1 %267 }
  0xbb   : > { %v270_v23 = vmul.f32 %v268_v13, %v259_v19  ;;  %v271_v24 = vmul.f32 %v268_v13, %v260_v20 }
  0xbc   : > { %815 = vmatmul.msk.f32.gmra.mxu0 %vm286_vm0, %v382_v34  ;;  %819 = vmatmul.msk.f32.gmra.mxu1 %vm286_vm0, %v382_v34 }
  0xc3   : > { %v581_v27 = vpop.permute.xlu1 %580 }
  0xc4   : > { %816 = vmatmul.msk.f32.gmra.mxu0 %vm286_vm0, %v383_v35  ;;  %820 = vmatmul.msk.f32.gmra.mxu1 %vm286_vm0, %v383_v35  ;;  %v583_v31 = vmul.f32 %v581_v27, %v270_v23  ;;  %v584_v32 = vmul.f32 %v581_v27, %v271_v24 }
 0x121   : > { %v1125_v36 = vpop.f32.mrf.mxu0  ;;  %v1127_v37 = vpop.f32.mrf.mxu1 }
 0x122   : > { %v374_v17 = vmul.f32 %v1125_v36, %v1125_v36  ;;  %v375_v18 = vmul.f32 %v1127_v37, %v1127_v37  ;;  %v586_v36 = vsel %vm585_vm2, %v583_v31, 0.0  ;;  %v593_v37 = vsel %vm585_vm2, %v584_v32, 0.0 }
 0x129   : > { %v431_v38 = vpop.f32.mrf.mxu0  ;;  %v460_v39 = vpop.f32.mrf.mxu1 }
 0x12a   : > { %v432_v58 = vadd.f32 %v431_v38, %v386_v57  ;;  %v461_v59 = vadd.f32 %v460_v39, %v386_v57  ;;  %v351_v11 = vpop.f32.mrf.mxu2  ;;  %v371_v12 = vpop.f32.mrf.mxu3 }
 0x12b   : > { %v376_v21 = vsub.f32 %v374_v17, %v351_v11  ;;  %v377_v22 = vsub.f32 %v375_v18, %v371_v12 }
 0x12c   : > { %v472_v1 = vmax.f32 %v432_v58, 0.0  ;;  %v473_v2 = vmax.f32 %v461_v59, 0.0 }
 0x12d   : > { %v378_v25 = vmul.f32 0.5, %v376_v21  ;;  %v379_v26 = vmul.f32 0.5, %v377_v22 }
 0x12f   : > { %v604_v34 = vmul.f32 %v602_v28, %v378_v25  ;;  %v605_v35 = vmul.f32 %v602_v28, %v379_v26 }
 0x131   : > { %v434_v40 = vpop.f32.mrf.mxu0  ;;  %v463_v41 = vpop.f32.mrf.mxu1  ;;  %v606_v38 = vsel %vm585_vm2, %v604_v34, 0.0  ;;  %v613_v39 = vsel %vm585_vm2, %v605_v35, 0.0 }
 0x132   : > { %v435_v53 = vadd.f32 %v434_v40, %v390_v45  ;;  %v464_v54 = vadd.f32 %v463_v41, %v390_v45 }
 0x134   : > { %v474_v63 = vmax.f32 %v435_v53, 0.0  ;;  %v475_v0 = vmax.f32 %v464_v54, 0.0 }
 0x139   : > { %v437_v43 = vpop.f32.mrf.mxu0  ;;  %v466_v44 = vpop.f32.mrf.mxu1 }
 0x13a   : > { %v438_v49 = vadd.f32 %v437_v43, %v395_v46  ;;  %v467_v50 = vadd.f32 %v466_v44, %v395_v46 }
 0x13c   : > { %v476_v60 = vmax.f32 %v438_v49, 0.0  ;;  %v477_v61 = vmax.f32 %v467_v50, 0.0  ;;  %v594_v49 = vrot.slane %v593_v37, 4  ;;  %v607_v50 = vrot.slane %v606_v38, 4 }
 0x141   : > { %v440_v47 = vpop.f32.mrf.mxu0  ;;  %v469_v48 = vpop.f32.mrf.mxu1 }
 0x142   : > { %v441_v51 = vadd.f32 %v440_v47, %v400_v42  ;;  %v470_v52 = vadd.f32 %v469_v48, %v400_v42  ;;  %v587_v48 = vrot.slane %v586_v36, 4 }
 0x144   : > { %v478_v55 = vmax.f32 %v441_v51, 0.0  ;;  %v479_v56 = vmax.f32 %v470_v52, 0.0  ;;  %v614_v51 = vrot.slane %v613_v39, 4  ;;  %v628_v52 = vpop.permute.xlu0 %627  ;;  %v588_v59 = vadd.f32 %v587_v48, %v586_v36 }
 0x146   : > { %525 = vmatpush.msrb.mxu2 %v478_v55  ;;  %554 = vmatpush.msrb.mxu3 %v479_v56  ;;  %v615_v62 = vadd.f32 %v614_v51, %v613_v39  ;;  %v589_v11 = vrot.slane %v588_v59, 2 }
 0x148   : > { %526 = vmatpush.msrb.mxu2 %v476_v60  ;;  %555 = vmatpush.msrb.mxu3 %v477_v61  ;;  %v595_v60 = vadd.f32 %v594_v49, %v593_v37  ;;  %v608_v61 = vadd.f32 %v607_v50, %v606_v38  ;;  %v590_v24 = vadd.f32 %v589_v11, %v588_v59  ;;  %v668_v50 = vpop.permute.xlu1 %667 }
 0x14a   : > { %527 = vmatpush.msrb.mxu2 %v474_v63  ;;  %556 = vmatpush.msrb.mxu3 %v475_v0  ;;  %v596_v12 = vrot.slane %v595_v60, 2  ;;  %v609_v13 = vrot.slane %v608_v61, 2 }
 0x14c   : > { %528 = vmatpush.msrb.mxu2 %v472_v1  ;;  %557 = vmatpush.msrb.mxu3 %v473_v2  ;;  %v636_v20 = vpop.permute.xlu0 %635  ;;  %v597_v25 = vadd.f32 %v596_v12, %v595_v60 }
 0x14d   : > { %821 = vmatmul.msk.f32.vlgmr.msrb.gmra.mxu2 %vm500_vm1, %v480_v3  ;;  %825 = vmatmul.msk.f32.vlgmr.msrb.gmra.mxu3 %vm500_vm1, %v480_v3 }
 0x14e   : > { %v598_v31 = vrot.slane %v597_v25, 1 }
 0x150   : > { %v599_v39 = vadd.f32 %v598_v31, %v597_v25 }
 0x155   : > { %822 = vmatmul.msk.f32.gmra.mxu2 %vm500_vm1, %v481_v4  ;;  %826 = vmatmul.msk.f32.gmra.mxu3 %vm500_vm1, %v481_v4 }
 0x15d   : > { %823 = vmatmul.msk.f32.gmra.mxu2 %vm500_vm1, %v482_v5  ;;  %827 = vmatmul.msk.f32.gmra.mxu3 %vm500_vm1, %v482_v5 }
 0x165   : > { %824 = vmatmul.msk.f32.gmra.mxu2 %vm500_vm1, %v483_v6  ;;  %828 = vmatmul.msk.f32.gmra.mxu3 %vm500_vm1, %v483_v6 }
 0x1d0   : > { %v530_v15 = vpop.f32.mrf.mxu2  ;;  %v559_v16 = vpop.f32.mrf.mxu3 }
 0x1d1   : > { %v531_v42 = vadd.f32 %v530_v15, %v486_v33  ;;  %v560_v43 = vadd.f32 %v559_v16, %v486_v33  ;;  %v616_v15 = vrot.slane %v615_v62, 2 }
 0x1d3   : > { %v571_v55 = vmax.f32 %v531_v42, 0.0  ;;  %v572_v56 = vmax.f32 %v560_v43, 0.0  ;;  %v617_v26 = vadd.f32 %v616_v15, %v615_v62  ;;  %v716_v15 = vlaneseq }
 0x1d5   : > { %v638_v1 = vmul.f32 %v624_v10, %v571_v55  ;;  %v639_v2 = vmul.f32 %v624_v10, %v572_v56  ;;  %v618_v33 = vrot.slane %v617_v26, 1  ;;  %vm718_vm12 = vcmp.lt.s32.totalorder %v716_v15, 256 }
 0x1d8   : > { %v533_v29 = vpop.f32.mrf.mxu2  ;;  %v562_v30 = vpop.f32.mrf.mxu3 }
 0x1d9   : > { %v534_v40 = vadd.f32 %v533_v29, %v490_v7  ;;  %v563_v41 = vadd.f32 %v562_v30, %v490_v7  ;;  %v591_v30 = vrot.slane %v590_v24, 1 }
 0x1db   : > { %v573_v53 = vmax.f32 %v534_v40, 0.0  ;;  %v574_v54 = vmax.f32 %v563_v41, 0.0  ;;  %v592_v38 = vadd.f32 %v591_v30, %v590_v24  ;;  %v619_v41 = vadd.f32 %v618_v33, %v617_v26 }
 0x1dd   : > { %v640_v63 = vmul.f32 %v628_v52, %v573_v53  ;;  %v641_v0 = vmul.f32 %v628_v52, %v574_v54 }
 0x1df   : > { %v646_v16 = vadd.f32 %v640_v63, %v638_v1  ;;  %v655_v17 = vadd.f32 %v641_v0, %v639_v2 }
 0x1e0   : > { %v536_v44 = vpop.f32.mrf.mxu2  ;;  %v565_v45 = vpop.f32.mrf.mxu3 }
 0x1e1   : > { %v537_v46 = vadd.f32 %v536_v44, %v494_v8  ;;  %v566_v47 = vadd.f32 %v565_v45, %v494_v8 }
 0x1e3   : > { %v575_v57 = vmax.f32 %v537_v46, 0.0  ;;  %v576_v58 = vmax.f32 %v566_v47, 0.0  ;;  %v621_v47 = vadd.f32 %v619_v41, %v599_v39 }
 0x1e5   : > { %v642_v5 = vmul.f32 %v632_v14, %v575_v57  ;;  %v643_v6 = vmul.f32 %v632_v14, %v576_v58  ;;  %v610_v14 = vadd.f32 %v609_v13, %v608_v61 }
 0x1e7   : > { %v647_v21 = vadd.f32 %v646_v16, %v642_v5  ;;  %v656_v22 = vadd.f32 %v655_v17, %v643_v6  ;;  %v611_v32 = vrot.slane %v610_v14, 1 }
 0x1e8   : > { %v539_v3 = vpop.f32.mrf.mxu2  ;;  %v568_v4 = vpop.f32.mrf.mxu3 }
 0x1e9   : > { %v540_v7 = vadd.f32 %v539_v3, %v1142_v9  ;;  %v569_v8 = vadd.f32 %v568_v4, %v1142_v9  ;;  %v612_v40 = vadd.f32 %v611_v32, %v610_v14 }
 0x1eb   : > { %v577_v18 = vmax.f32 %v540_v7, 0.0  ;;  %v578_v19 = vmax.f32 %v569_v8, 0.0  ;;  %v620_v46 = vadd.f32 %v612_v40, %v592_v38 }
 0x1ed   : > { %v644_v10 = vmul.f32 %v636_v20, %v577_v18  ;;  %v645_v23 = vmul.f32 %v636_v20, %v578_v19 }
 0x1ef   : > { %v648_v27 = vadd.f32 %v647_v21, %v644_v10  ;;  %v657_v28 = vadd.f32 %v656_v22, %v645_v23 }
 0x1f1   : > { %v649_v9 = vrot.slane %v648_v27, 4  ;;  %v658_v29 = vrot.slane %v657_v28, 4 }
 0x1f3   : > { %v650_v34 = vadd.f32 %v649_v9, %v648_v27  ;;  %v659_v35 = vadd.f32 %v658_v29, %v657_v28 }
 0x1f5   : > { %v651_v36 = vrot.slane %v650_v34, 2  ;;  %v660_v37 = vrot.slane %v659_v35, 2 }
 0x1f7   : > { %v652_v42 = vadd.f32 %v651_v36, %v650_v34  ;;  %v661_v43 = vadd.f32 %v660_v37, %v659_v35 }
 0x1f9   : > { %v653_v44 = vrot.slane %v652_v42, 1  ;;  %v662_v45 = vrot.slane %v661_v43, 1 }
 0x1fb   : > { %v654_v48 = vadd.f32 %v653_v44, %v652_v42  ;;  %v663_v49 = vadd.f32 %v662_v45, %v661_v43 }
 0x1fd   : > { %v664_v51 = vadd.f32 %v654_v48, %v620_v46  ;;  %v665_v52 = vadd.f32 %v663_v49, %v621_v47 }
 0x1ff   : > { %v670_v53 = vadd.f32 %v668_v50, %v664_v51  ;;  %v671_v54 = vadd.f32 %v668_v50, %v665_v52 }
 0x201   : > { %v829_v55 = vmul.f32 -1.442695, %v670_v53  ;;  %v830_v56 = vmul.f32 -1.442695, %v671_v54 }
 0x203   : > { %898 = vpow2.f32 %v829_v55 }
 0x204   : > { %900 = vpow2.f32 %v830_v56 }
 0x209   : > { %v899_v57 = vpop.eup %898 }
 0x20a   : > { %v901_v58 = vpop.eup %900  ;;  %v678_v59 = vadd.f32 1.0, %v899_v57 }
 0x20b   : > { %v679_v60 = vadd.f32 1.0, %v901_v58 }
 0x20c   : > { %902 = vrcp.f32 %v678_v59  ;;  %vm685_vm5 = vweird.f32 %v678_v59  ;;  %v691_v8 = vand.u32 2147483648, %v678_v59  ;;  %v689_v12 = vand.u32 2147483647, %v678_v59 }
 0x20d   : > { %904 = vrcp.f32 %v679_v60  ;;  %v706_v4 = vand.u32 2147483648, %v679_v60  ;;  %v704_v6 = vand.u32 2147483647, %v679_v60  ;;  %vm700_vm6 = vweird.f32 %v679_v60 }
 0x20e   : > { %v692_v19 = vor.u32 1.1754944e-38, %v691_v8  ;;  %vm690_vm11 = vcmp.eq.f32.partialorder %v689_v12, 8.507059e+37 }
 0x20f   : > { %v707_v16 = vor.u32 1.1754944e-38, %v706_v4  ;;  %vm705_vm9 = vcmp.eq.f32.partialorder %v704_v6, 8.507059e+37 }
 0x212   : > { %v903_v61 = vpop.eup %902 }
 0x213   : > { %v905_v62 = vpop.eup %904  ;;  %v681_v63 = vmul.f32 %v903_v61, %v678_v59  ;;  %vm686_vm3 = vweird.f32 %v903_v61 }
 0x214   : > { %v696_v0 = vmul.f32 %v905_v62, %v679_v60  ;;  %vm701_vm4 = vweird.f32 %v905_v62  ;;  %vm1158_vm7 = vmor %vm685_vm5, %vm686_vm3 }
 0x215   : > { %v682_v1 = vsub.f32 1.0, %v681_v63  ;;  %vm702_vm8 = vmor %vm700_vm6, %vm701_vm4 }
 0x216   : > { %v697_v2 = vsub.f32 1.0, %v696_v0 }
 0x217   : > { %v683_v3 = vmul.f32 %v903_v61, %v682_v1 }
 0x218   : > { %v698_v5 = vmul.f32 %v905_v62, %v697_v2 }
 0x219   : > { %v684_v7 = vadd.f32 %v903_v61, %v683_v3 }
 0x21a   : > { %v699_v13 = vadd.f32 %v905_v62, %v698_v5 }
 0x21b   : > { %v688_v17 = vsel %vm1158_vm7, %v903_v61, %v684_v7 }
 0x21c   : > { %v703_v18 = vsel %vm702_vm8, %v905_v62, %v699_v13  ;;  %v693_v22 = vsel %vm690_vm11, %v692_v19, %v688_v17 }
 0x21d   : > { %v708_v20 = vsel %vm705_vm9, %v707_v16, %v703_v18 }
 0x21e   : > { %v712_v21 = vrot.slane %v708_v20, 7 }
 0x220   : > { %v714_v10 = vsel %vm713_vm10, %v693_v22, %v712_v21 }
 0x221   : > { %720 = vst.msk [vmem:[%s252_s22] sm:$0x3] %vm718_vm12, %v714_v10 }
 0x222   : > { %933 = shalt.err (!%p930_p5)
}
 0x223   : > { %838 = dma.vmem_to_hbm [thread:$0]  (%p1046_p6), %s735_s15, 32, %s737_s16, %s722_s17  }
 0x224 PF: > { %p844_p7 = scmp.ge.s32.totalorder %s968_s21, 2  ;;  %s748_s26 = sand.u32 1, %s956_s18  }
 0x225   : > { %s749_s6 = scalar_lea.sflag [#allocation4], %s748_s26 }
 0x226   : > { %p841_p9 = pnand %p844_p7, %p1050_p8 }
 0x228   : > { %p842_p10 = pneg %p841_p9 }
 0x22a   : > { %951 = dma.done.wait (%p842_p10), %s749_s6, 32  }
 0x22b   : > { %953 = vsyncadd (%p842_p10), %s749_s6, 4294967264  ;;  %p15_p11 = scmp.ge.s32.totalorder %s1031_s24, 6   ;;  %s1202_s18 = smov %s960_s19 }
 0x22c   : > { %s1203_s19 = smov %s964_s20  ;;  %s1204_s20 = smov %s1044_s27 }
 0x22d   : > { %s1205_s21 = smov %s1031_s24  ;;  %17 = sbr.rel (!%p15_p11) target bundleno = 3 (0x3), region = 103 }
 0x232   :  { %755 = vsyncpa [#allocation4], 1 }
 0x233   :  { %757 = vsyncpa [#allocation4 + $0x1], 1 }

</bundles_post_ra>
